<compile_context>
chip_gen: v7x
topology: tpu7x:2x2x1
jax: 0.10.0
libtpu: 0.0.40
codegen_flags: <defaults>
</compile_context>

<pallas_src>
import math

import jax
import jax.numpy as jnp
import numpy as np
from jax.experimental import pallas as pl
from jax.experimental.pallas import tpu as pltpu

# ----------------------------- configuration -------------------------------
D_MODEL = 32
NHEAD = 4
DIM_FF = 64
SEQ = 8      # dim 0 of module input x (attended sequence)
BATCH = 2    # dim 1 of module input x (batch; also the Conv1d length axis)
LN_EPS = 1e-5
BN_EPS = 1e-5

HEAD_DIM = D_MODEL // NHEAD
N_ROWS = SEQ * BATCH            # flattened (seq, batch) rows inside the kernel
NEG_INF = -1e30

# packed small-vector rows (each row uses the leading lanes of a 128-lane row)
_QKV_B, _OUT_B, _LN1_W, _LN1_B, _FF1_B, _FF2_B, _LN2_W, _LN2_B, _CONV_B = range(9)
VEC_ROWS = 9
VEC_LANES = 128


# ------------------------------ shared math ---------------------------------
def _layernorm(y, w, b):
    mu = jnp.mean(y, axis=-1, keepdims=True)
    var = jnp.mean(jnp.square(y - mu), axis=-1, keepdims=True)
    return (y - mu) * jax.lax.rsqrt(var + LN_EPS) * w + b


# ------------------------------ Pallas kernel -------------------------------
def encoder_conv_kernel(x_ref, wqkv_ref, wout_ref, wff1_ref, wff2_ref,
                        wconv_ref, vec_ref, out_ref):
    E, F, H, dh = D_MODEL, DIM_FF, NHEAD, HEAD_DIM
    B, N = BATCH, N_ROWS

    x = x_ref[...]                      # (N, E), seq-major rows: r = s*B + b
    vec = vec_ref[...]                  # (VEC_ROWS, 128) packed small vectors

    # Batch-identity helpers built from in-kernel iotas: rows r, r' belong to
    # the same sequence (same batch index) iff r % B == r' % B.
    row_b = jax.lax.broadcasted_iota(jnp.int32, (N, 1), 0) % B      # (N, 1)
    col_b = jax.lax.broadcasted_iota(jnp.int32, (1, N), 1) % B      # (1, N)
    attn_bias = jnp.where(row_b == col_b, 0.0, NEG_INF)             # (N, N)
    not_first = (row_b != 0).astype(jnp.float32)                    # b > 0
    not_last = (row_b != B - 1).astype(jnp.float32)                 # b < B-1

    # --- packed QKV projection (1/sqrt(dh) is pre-folded into the Q block) ---
    qkv = jnp.dot(x, wqkv_ref[...], preferred_element_type=jnp.float32)
    qkv = qkv + vec[_QKV_B:_QKV_B + 1, :3 * E]                      # (N, 3E)

    # --- multi-head self-attention: per head, full-(N,N) scores with a
    #     block-diagonal same-batch mask; plain 2-D matmuls only. ---
    heads = []
    for h in range(H):
        q_h = qkv[:, 0 * E + h * dh: 0 * E + (h + 1) * dh]          # (N, dh)
        k_h = qkv[:, 1 * E + h * dh: 1 * E + (h + 1) * dh]
        v_h = qkv[:, 2 * E + h * dh: 2 * E + (h + 1) * dh]
        s = jax.lax.dot_general(q_h, k_h, (((1,), (1,)), ((), ())),
                                preferred_element_type=jnp.float32)  # (N, N)
        s = s + attn_bias
        s = s - jnp.max(s, axis=-1, keepdims=True)
        p = jnp.exp(s)
        p = p * pl.reciprocal(jnp.sum(p, axis=-1, keepdims=True), approx=True)
        heads.append(jnp.dot(p, v_h, preferred_element_type=jnp.float32))
    attn = jnp.concatenate(heads, axis=-1)                           # (N, E)
    attn = jnp.dot(attn, wout_ref[...], preferred_element_type=jnp.float32) \
        + vec[_OUT_B:_OUT_B + 1, :E]

    # --- residual + norm1 (dropout = identity in eval mode) ---
    y = _layernorm(x + attn, vec[_LN1_W:_LN1_W + 1, :E], vec[_LN1_B:_LN1_B + 1, :E])

    # --- feed-forward (relu) + residual + norm2 ---
    h1 = jnp.maximum(
        jnp.dot(y, wff1_ref[...], preferred_element_type=jnp.float32)
        + vec[_FF1_B:_FF1_B + 1, :F], 0.0)
    h2 = jnp.dot(h1, wff2_ref[...], preferred_element_type=jnp.float32) \
        + vec[_FF2_B:_FF2_B + 1, :E]
    y = _layernorm(y + h2, vec[_LN2_W:_LN2_W + 1, :E], vec[_LN2_B:_LN2_B + 1, :E])

    # --- Conv1d(E,E,k=3,p=1) along the batch axis (BN folded), ReLU ---
    # Row r = s*B + b: tap b-1 is row r-1 (valid iff b>0), tap b+1 is row r+1
    # (valid iff b<B-1).  Three accumulated matmuls, no tap concatenation.
    zero_row = jnp.zeros((1, E), jnp.float32)
    y_prev = jnp.concatenate([zero_row, y[:N - 1]], axis=0) * not_first  # y[r-1]
    y_next = jnp.concatenate([y[1:], zero_row], axis=0) * not_last       # y[r+1]
    z = jnp.dot(y, wconv_ref[1], preferred_element_type=jnp.float32)
    z = z + jnp.dot(y_prev, wconv_ref[0], preferred_element_type=jnp.float32)
    z = z + jnp.dot(y_next, wconv_ref[2], preferred_element_type=jnp.float32)
    z = z + vec[_CONV_B:_CONV_B + 1, :E]
    out_ref[...] = jnp.maximum(z, 0.0)


# --------------------------- host-side preparation ---------------------------
def prepare_params(params):
    """Pre-transpose weights, fold the softmax scale into the Q projection,
    fold eval-mode BatchNorm into the conv, and pack all small vectors into one
    (VEC_ROWS, 128) array.  Done once, outside the per-call wrapper."""
    E, F = D_MODEL, DIM_FF
    scale = 1.0 / math.sqrt(HEAD_DIM)

    w_qkv = jnp.transpose(params["in_proj_w"]).astype(jnp.float32)      # (E, 3E)
    w_qkv = w_qkv.at[:, :E].multiply(scale)                             # fold 1/sqrt(dh)
    b_qkv = params["in_proj_b"].reshape(-1).astype(jnp.float32)         # (3E,)
    b_qkv = b_qkv.at[:E].multiply(scale)

    w_out = jnp.transpose(params["out_proj_w"]).astype(jnp.float32)     # (E, E)
    w_ff1 = jnp.transpose(params["lin1_w"]).astype(jnp.float32)         # (E, F)
    w_ff2 = jnp.transpose(params["lin2_w"]).astype(jnp.float32)         # (F, E)

    # BatchNorm1d (eval) folded into the conv: y*s + t
    bn_scale = params["bn_gamma"] * jax.lax.rsqrt(params["bn_var"] + BN_EPS)  # (1,E)
    bn_shift = params["bn_beta"] - params["bn_mean"] * bn_scale               # (1,E)
    w_conv = (params["conv_w"] * bn_scale).astype(jnp.float32)                # (3,E,E)
    b_conv = params["conv_b"] * bn_scale + bn_shift                           # (1,E)

    vecs = jnp.zeros((VEC_ROWS, VEC_LANES), jnp.float32)
    vecs = vecs.at[_QKV_B, :3 * E].set(b_qkv)
    vecs = vecs.at[_OUT_B, :E].set(params["out_proj_b"].reshape(-1))
    vecs = vecs.at[_LN1_W, :E].set(params["ln1_w"].reshape(-1))
    vecs = vecs.at[_LN1_B, :E].set(params["ln1_b"].reshape(-1))
    vecs = vecs.at[_FF1_B, :F].set(params["lin1_b"].reshape(-1))
    vecs = vecs.at[_FF2_B, :E].set(params["lin2_b"].reshape(-1))
    vecs = vecs.at[_LN2_W, :E].set(params["ln2_w"].reshape(-1))
    vecs = vecs.at[_LN2_B, :E].set(params["ln2_b"].reshape(-1))
    vecs = vecs.at[_CONV_B, :E].set(b_conv.reshape(-1))

    return (w_qkv, w_out, w_ff1, w_ff2, w_conv, vecs)


@jax.jit
def transformer_encoder_conv_norm_relu(x, prepared):
    """x: (S, B, E) float32 -> (S, B, E).  `prepared` = prepare_params(params).

    The kernel consumes the caller's row-major (S, B, E) layout directly as a
    seq-major (S*B, E) slab, so both reshapes here are free metadata ops (no
    XLA transpose/copy fusions around the custom call)."""
    x2d = x.reshape(N_ROWS, D_MODEL)
    vmem = pl.BlockSpec(memory_space=pltpu.MemorySpace.VMEM)   # whole-array, no grid
    out = pl.pallas_call(
        encoder_conv_kernel,
        in_specs=[vmem] * 7,
        out_specs=vmem,
        out_shape=jax.ShapeDtypeStruct((N_ROWS, D_MODEL), jnp.float32),
    )(x2d, *prepared)
    return out.reshape(SEQ, BATCH, D_MODEL)


# ------------------------------ pure-JAX reference ---------------------------
def _reference_forward(x_bse, p):
    """Faithful (unfused, un-transposed) eval-mode math on (B, S, E)."""
    B, S, E = x_bse.shape
    H, dh = NHEAD, HEAD_DIM
    scale = 1.0 / math.sqrt(dh)

    ys = []
    for b in range(B):
        xb = x_bse[b]                                                  # (S, E)
        qkv = jnp.dot(xb, p["in_proj_w"].T) + p["in_proj_b"]
        q, k, v = qkv[:, :E], qkv[:, E:2 * E], qkv[:, 2 * E:]
        heads = []
        for h in range(H):
            qh = q[:, h * dh:(h + 1) * dh]
            kh = k[:, h * dh:(h + 1) * dh]
            vh = v[:, h * dh:(h + 1) * dh]
            s = jnp.dot(qh, kh.T) * scale
            s = s - jnp.max(s, axis=-1, keepdims=True)
            prob = jnp.exp(s)
            prob = prob / jnp.sum(prob, axis=-1, keepdims=True)
            heads.append(jnp.dot(prob, vh))
        attn = jnp.dot(jnp.concatenate(heads, axis=-1), p["out_proj_w"].T) + p["out_proj_b"]
        y = _layernorm(xb + attn, p["ln1_w"], p["ln1_b"])
        h1 = jnp.maximum(jnp.dot(y, p["lin1_w"].T) + p["lin1_b"], 0.0)
        h2 = jnp.dot(h1, p["lin2_w"].T) + p["lin2_b"]
        ys.append(_layernorm(y + h2, p["ln2_w"], p["ln2_b"]))
    y = jnp.stack(ys, axis=0)                                          # (B, S, E)

    zero = jnp.zeros((1, S, E), jnp.float32)
    y_prev = jnp.concatenate([zero, y[:-1]], axis=0)
    y_next = jnp.concatenate([y[1:], zero], axis=0)
    acc = jnp.zeros((B * S, E), jnp.float32)
    for kk, yk in enumerate((y_prev, y, y_next)):
        acc = acc + jnp.dot(yk.reshape(B * S, E), p["conv_w"][kk])
    z = acc + p["conv_b"]
    z = (z - p["bn_mean"]) * jax.lax.rsqrt(p["bn_var"] + BN_EPS) * p["bn_gamma"] + p["bn_beta"]
    return jnp.maximum(z, 0.0).reshape(B, S, E)


# ------------------------------ parameter init ------------------------------
def init_params(key):
    E, F = D_MODEL, DIM_FF
    ks = jax.random.split(key, 18)

    def n(k, shape, scale=0.05):
        return (scale * jax.random.normal(k, shape)).astype(jnp.float32)

    return {
        # nn.MultiheadAttention packed projections
        "in_proj_w": n(ks[0], (3 * E, E)),
        "in_proj_b": n(ks[1], (1, 3 * E)),
        "out_proj_w": n(ks[2], (E, E)),
        "out_proj_b": n(ks[3], (1, E)),
        # norm1 / FFN / norm2
        "ln1_w": (1.0 + n(ks[4], (1, E))).astype(jnp.float32),
        "ln1_b": n(ks[5], (1, E)),
        "lin1_w": n(ks[6], (F, E)),
        "lin1_b": n(ks[7], (1, F)),
        "lin2_w": n(ks[8], (E, F)),
        "lin2_b": n(ks[9], (1, E)),
        "ln2_w": (1.0 + n(ks[10], (1, E))).astype(jnp.float32),
        "ln2_b": n(ks[11], (1, E)),
        # Conv1d(E, E, kernel_size=3, padding=1): PyTorch weight (E_out, E_in, 3)
        # stored pre-transposed as (3, E_in, E_out) so tap kk is a plain matmul.
        "conv_w": n(ks[12], (3, E, E)),
        "conv_b": n(ks[13], (1, E)),
        # BatchNorm1d(E) — eval mode, running statistics
        "bn_gamma": (1.0 + n(ks[14], (1, E))).astype(jnp.float32),
        "bn_beta": n(ks[15], (1, E)),
        "bn_mean": n(ks[16], (1, E)),
        "bn_var": (0.5 + jax.random.uniform(ks[17], (1, E))).astype(jnp.float32),
    }


# ---------------------------------- main -------------------------------------
if __name__ == "__main__":
    key = jax.random.PRNGKey(0)
    kx, kp = jax.random.split(key)
    x = jax.random.normal(kx, (SEQ, BATCH, D_MODEL), dtype=jnp.float32)
    params = init_params(kp)

    prepared = prepare_params(params)
    out = jax.block_until_ready(transformer_encoder_conv_norm_relu(x, prepared))

    # pure-JAX reference (original, unfused math)
    ref = jnp.transpose(
        _reference_forward(jnp.transpose(x, (1, 0, 2)), params), (1, 0, 2))

    assert out.shape == x.shape
    np.testing.assert_allclose(np.asarray(out), np.asarray(ref),
                               atol=1e-3, rtol=1e-3)
    print("KERNEL_OK")
</pallas_src>

<mosaic_0001>
module attributes {stable_mosaic.version = 11 : i64} {
  func.func @encoder_conv_kernel(%arg0: memref<16x32xf32, #tpu.memory_space<vmem>>, %arg1: memref<32x96xf32, #tpu.memory_space<vmem>>, %arg2: memref<32x32xf32, #tpu.memory_space<vmem>>, %arg3: memref<32x64xf32, #tpu.memory_space<vmem>>, %arg4: memref<64x32xf32, #tpu.memory_space<vmem>>, %arg5: memref<3x32x32xf32, #tpu.memory_space<vmem>>, %arg6: memref<9x128xf32, #tpu.memory_space<vmem>>, %arg7: memref<16x32xf32, #tpu.memory_space<vmem>>) attributes {dimension_semantics = [], scalar_prefetch = 0 : i64, scratch_operands = 0 : i64, tpu.core_type = #tpu.core_type<tc>} {
    %c0 = arith.constant 0 : index
    %c0_0 = arith.constant 0 : index
    %0 = vector.load %arg0[%c0, %c0_0] : memref<16x32xf32, #tpu.memory_space<vmem>>, vector<16x32xf32>
    %c0_1 = arith.constant 0 : index
    %c0_2 = arith.constant 0 : index
    %1 = vector.load %arg6[%c0_1, %c0_2] : memref<9x128xf32, #tpu.memory_space<vmem>>, vector<9x128xf32>
    %2 = tpu.iota {dimensions = array<i32: 0>} : vector<16x1xi32>
    %c2_i32 = arith.constant 2 : i32
    %c0_i32 = arith.constant 0 : i32
    %3 = arith.cmpi eq, %c2_i32, %c0_i32 : i32
    %c1_i32 = arith.constant 1 : i32
    %4 = arith.select %3, %c1_i32, %c2_i32 : i32
    %5 = vector.broadcast %4 : i32 to vector<16x1xi32>
    %6 = arith.remsi %2, %5 : vector<16x1xi32>
    %c0_i32_3 = arith.constant 0 : i32
    %7 = vector.broadcast %c0_i32_3 : i32 to vector<16x1xi32>
    %8 = arith.cmpi ne, %6, %7 : vector<16x1xi32>
    %c0_i32_4 = arith.constant 0 : i32
    %9 = vector.broadcast %c0_i32_4 : i32 to vector<16x1xi32>
    %10 = arith.cmpi slt, %6, %9 : vector<16x1xi32>
    %c0_i32_5 = arith.constant 0 : i32
    %11 = arith.cmpi slt, %4, %c0_i32_5 : i32
    %12 = vector.broadcast %11 : i1 to vector<16x1xi1>
    %13 = vector.broadcast %12 : vector<16x1xi1> to vector<16x1xi1>
    %14 = arith.xori %10, %13 : vector<16x1xi1>
    %15 = arith.andi %14, %8 : vector<16x1xi1>
    %16 = vector.broadcast %4 : i32 to vector<16x1xi32>
    %17 = arith.addi %6, %16 : vector<16x1xi32>
    %18 = arith.select %15, %17, %6 : vector<16x1xi1>, vector<16x1xi32>
    %19 = tpu.iota {dimensions = array<i32: 1>} : vector<1x16xi32>
    %c2_i32_6 = arith.constant 2 : i32
    %c0_i32_7 = arith.constant 0 : i32
    %20 = arith.cmpi eq, %c2_i32_6, %c0_i32_7 : i32
    %c1_i32_8 = arith.constant 1 : i32
    %21 = arith.select %20, %c1_i32_8, %c2_i32_6 : i32
    %22 = vector.broadcast %21 : i32 to vector<1x16xi32>
    %23 = arith.remsi %19, %22 : vector<1x16xi32>
    %c0_i32_9 = arith.constant 0 : i32
    %24 = vector.broadcast %c0_i32_9 : i32 to vector<1x16xi32>
    %25 = arith.cmpi ne, %23, %24 : vector<1x16xi32>
    %c0_i32_10 = arith.constant 0 : i32
    %26 = vector.broadcast %c0_i32_10 : i32 to vector<1x16xi32>
    %27 = arith.cmpi slt, %23, %26 : vector<1x16xi32>
    %c0_i32_11 = arith.constant 0 : i32
    %28 = arith.cmpi slt, %21, %c0_i32_11 : i32
    %29 = vector.broadcast %28 : i1 to vector<1x16xi1>
    %30 = vector.broadcast %29 : vector<1x16xi1> to vector<1x16xi1>
    %31 = arith.xori %27, %30 : vector<1x16xi1>
    %32 = arith.andi %31, %25 : vector<1x16xi1>
    %33 = vector.broadcast %21 : i32 to vector<1x16xi32>
    %34 = arith.addi %23, %33 : vector<1x16xi32>
    %35 = arith.select %32, %34, %23 : vector<1x16xi1>, vector<1x16xi32>
    %36 = vector.broadcast %18 : vector<16x1xi32> to vector<16x16xi32>
    %37 = vector.broadcast %35 : vector<1x16xi32> to vector<16x16xi32>
    %38 = arith.cmpi eq, %36, %37 : vector<16x16xi32>
    %cst = arith.constant 0.000000e+00 : f32
    %cst_12 = arith.constant -1.000000e+30 : f32
    %39 = vector.broadcast %cst : f32 to vector<16x16xf32>
    %40 = vector.broadcast %cst_12 : f32 to vector<16x16xf32>
    %41 = arith.select %38, %39, %40 : vector<16x16xi1>, vector<16x16xf32>
    %c0_i32_13 = arith.constant 0 : i32
    %42 = vector.broadcast %c0_i32_13 : i32 to vector<16x1xi32>
    %43 = arith.cmpi ne, %18, %42 : vector<16x1xi32>
    %44 = arith.extui %43 : vector<16x1xi1> to vector<16x1xi32>
    %45 = arith.sitofp %44 : vector<16x1xi32> to vector<16x1xf32>
    %c1_i32_14 = arith.constant 1 : i32
    %46 = vector.broadcast %c1_i32_14 : i32 to vector<16x1xi32>
    %47 = arith.cmpi ne, %18, %46 : vector<16x1xi32>
    %48 = arith.extui %47 : vector<16x1xi1> to vector<16x1xi32>
    %49 = arith.sitofp %48 : vector<16x1xi32> to vector<16x1xf32>
    %c0_15 = arith.constant 0 : index
    %c0_16 = arith.constant 0 : index
    %50 = vector.load %arg1[%c0_15, %c0_16] : memref<32x96xf32, #tpu.memory_space<vmem>>, vector<32x96xf32>
    %cst_17 = arith.constant dense<0.000000e+00> : vector<16x96xf32>
    %51 = tpu.matmul %0, %50, %cst_17 {dimension_numbers = #tpu.dot_dimension_numbers<[1], [0], [0], [1], [0, 0, 1, 1], [], []>} : vector<16x32xf32>, vector<32x96xf32>, vector<16x96xf32> -> vector<16x96xf32>
    %52 = vector.extract_strided_slice %1 {offsets = [0, 0], sizes = [1, 96], strides = [1, 1]} : vector<9x128xf32> to vector<1x96xf32>
    %53 = vector.broadcast %52 : vector<1x96xf32> to vector<16x96xf32>
    %54 = arith.addf %51, %53 : vector<16x96xf32>
    %55 = vector.extract_strided_slice %54 {offsets = [0, 0], sizes = [16, 8], strides = [1, 1]} : vector<16x96xf32> to vector<16x8xf32>
    %56 = vector.extract_strided_slice %54 {offsets = [0, 32], sizes = [16, 8], strides = [1, 1]} : vector<16x96xf32> to vector<16x8xf32>
    %57 = vector.extract_strided_slice %54 {offsets = [0, 64], sizes = [16, 8], strides = [1, 1]} : vector<16x96xf32> to vector<16x8xf32>
    %cst_18 = arith.constant dense<0.000000e+00> : vector<16x16xf32>
    %58 = tpu.matmul %55, %56, %cst_18 {dimension_numbers = #tpu.dot_dimension_numbers<[1], [1], [0], [0], [0, 0, 1, 0], [], []>} : vector<16x8xf32>, vector<16x8xf32>, vector<16x16xf32> -> vector<16x16xf32>
    %59 = arith.addf %58, %41 : vector<16x16xf32>
    %cst_19 = arith.constant dense<0xFF800000> : vector<16xf32>
    %60 = vector.multi_reduction <maximumf>, %59, %cst_19 [1] : vector<16x16xf32> to vector<16xf32>
    %61 = vector.shape_cast %60 : vector<16xf32> to vector<16x1xf32>
    %62 = vector.broadcast %61 : vector<16x1xf32> to vector<16x16xf32>
    %63 = arith.subf %59, %62 : vector<16x16xf32>
    %64 = math.exp %63 : vector<16x16xf32>
    %cst_20 = arith.constant dense<0.000000e+00> : vector<16xf32>
    %65 = vector.multi_reduction <add>, %64, %cst_20 [1] : vector<16x16xf32> to vector<16xf32>
    %66 = vector.shape_cast %65 : vector<16xf32> to vector<16x1xf32>
    %67 = tpu.reciprocal %66 {approx = true} : vector<16x1xf32> -> vector<16x1xf32>
    %68 = vector.broadcast %67 : vector<16x1xf32> to vector<16x16xf32>
    %69 = arith.mulf %64, %68 : vector<16x16xf32>
    %cst_21 = arith.constant dense<0.000000e+00> : vector<16x8xf32>
    %70 = tpu.matmul %69, %57, %cst_21 {dimension_numbers = #tpu.dot_dimension_numbers<[1], [0], [0], [1], [0, 0, 1, 1], [], []>} : vector<16x16xf32>, vector<16x8xf32>, vector<16x8xf32> -> vector<16x8xf32>
    %71 = vector.extract_strided_slice %54 {offsets = [0, 8], sizes = [16, 8], strides = [1, 1]} : vector<16x96xf32> to vector<16x8xf32>
    %72 = vector.extract_strided_slice %54 {offsets = [0, 40], sizes = [16, 8], strides = [1, 1]} : vector<16x96xf32> to vector<16x8xf32>
    %73 = vector.extract_strided_slice %54 {offsets = [0, 72], sizes = [16, 8], strides = [1, 1]} : vector<16x96xf32> to vector<16x8xf32>
    %cst_22 = arith.constant dense<0.000000e+00> : vector<16x16xf32>
    %74 = tpu.matmul %71, %72, %cst_22 {dimension_numbers = #tpu.dot_dimension_numbers<[1], [1], [0], [0], [0, 0, 1, 0], [], []>} : vector<16x8xf32>, vector<16x8xf32>, vector<16x16xf32> -> vector<16x16xf32>
    %75 = arith.addf %74, %41 : vector<16x16xf32>
    %cst_23 = arith.constant dense<0xFF800000> : vector<16xf32>
    %76 = vector.multi_reduction <maximumf>, %75, %cst_23 [1] : vector<16x16xf32> to vector<16xf32>
    %77 = vector.shape_cast %76 : vector<16xf32> to vector<16x1xf32>
    %78 = vector.broadcast %77 : vector<16x1xf32> to vector<16x16xf32>
    %79 = arith.subf %75, %78 : vector<16x16xf32>
    %80 = math.exp %79 : vector<16x16xf32>
    %cst_24 = arith.constant dense<0.000000e+00> : vector<16xf32>
    %81 = vector.multi_reduction <add>, %80, %cst_24 [1] : vector<16x16xf32> to vector<16xf32>
    %82 = vector.shape_cast %81 : vector<16xf32> to vector<16x1xf32>
    %83 = tpu.reciprocal %82 {approx = true} : vector<16x1xf32> -> vector<16x1xf32>
    %84 = vector.broadcast %83 : vector<16x1xf32> to vector<16x16xf32>
    %85 = arith.mulf %80, %84 : vector<16x16xf32>
    %cst_25 = arith.constant dense<0.000000e+00> : vector<16x8xf32>
    %86 = tpu.matmul %85, %73, %cst_25 {dimension_numbers = #tpu.dot_dimension_numbers<[1], [0], [0], [1], [0, 0, 1, 1], [], []>} : vector<16x16xf32>, vector<16x8xf32>, vector<16x8xf32> -> vector<16x8xf32>
    %87 = vector.extract_strided_slice %54 {offsets = [0, 16], sizes = [16, 8], strides = [1, 1]} : vector<16x96xf32> to vector<16x8xf32>
    %88 = vector.extract_strided_slice %54 {offsets = [0, 48], sizes = [16, 8], strides = [1, 1]} : vector<16x96xf32> to vector<16x8xf32>
    %89 = vector.extract_strided_slice %54 {offsets = [0, 80], sizes = [16, 8], strides = [1, 1]} : vector<16x96xf32> to vector<16x8xf32>
    %cst_26 = arith.constant dense<0.000000e+00> : vector<16x16xf32>
    %90 = tpu.matmul %87, %88, %cst_26 {dimension_numbers = #tpu.dot_dimension_numbers<[1], [1], [0], [0], [0, 0, 1, 0], [], []>} : vector<16x8xf32>, vector<16x8xf32>, vector<16x16xf32> -> vector<16x16xf32>
    %91 = arith.addf %90, %41 : vector<16x16xf32>
    %cst_27 = arith.constant dense<0xFF800000> : vector<16xf32>
    %92 = vector.multi_reduction <maximumf>, %91, %cst_27 [1] : vector<16x16xf32> to vector<16xf32>
    %93 = vector.shape_cast %92 : vector<16xf32> to vector<16x1xf32>
    %94 = vector.broadcast %93 : vector<16x1xf32> to vector<16x16xf32>
    %95 = arith.subf %91, %94 : vector<16x16xf32>
    %96 = math.exp %95 : vector<16x16xf32>
    %cst_28 = arith.constant dense<0.000000e+00> : vector<16xf32>
    %97 = vector.multi_reduction <add>, %96, %cst_28 [1] : vector<16x16xf32> to vector<16xf32>
    %98 = vector.shape_cast %97 : vector<16xf32> to vector<16x1xf32>
    %99 = tpu.reciprocal %98 {approx = true} : vector<16x1xf32> -> vector<16x1xf32>
    %100 = vector.broadcast %99 : vector<16x1xf32> to vector<16x16xf32>
    %101 = arith.mulf %96, %100 : vector<16x16xf32>
    %cst_29 = arith.constant dense<0.000000e+00> : vector<16x8xf32>
    %102 = tpu.matmul %101, %89, %cst_29 {dimension_numbers = #tpu.dot_dimension_numbers<[1], [0], [0], [1], [0, 0, 1, 1], [], []>} : vector<16x16xf32>, vector<16x8xf32>, vector<16x8xf32> -> vector<16x8xf32>
    %103 = vector.extract_strided_slice %54 {offsets = [0, 24], sizes = [16, 8], strides = [1, 1]} : vector<16x96xf32> to vector<16x8xf32>
    %104 = vector.extract_strided_slice %54 {offsets = [0, 56], sizes = [16, 8], strides = [1, 1]} : vector<16x96xf32> to vector<16x8xf32>
    %105 = vector.extract_strided_slice %54 {offsets = [0, 88], sizes = [16, 8], strides = [1, 1]} : vector<16x96xf32> to vector<16x8xf32>
    %cst_30 = arith.constant dense<0.000000e+00> : vector<16x16xf32>
    %106 = tpu.matmul %103, %104, %cst_30 {dimension_numbers = #tpu.dot_dimension_numbers<[1], [1], [0], [0], [0, 0, 1, 0], [], []>} : vector<16x8xf32>, vector<16x8xf32>, vector<16x16xf32> -> vector<16x16xf32>
    %107 = arith.addf %106, %41 : vector<16x16xf32>
    %cst_31 = arith.constant dense<0xFF800000> : vector<16xf32>
    %108 = vector.multi_reduction <maximumf>, %107, %cst_31 [1] : vector<16x16xf32> to vector<16xf32>
    %109 = vector.shape_cast %108 : vector<16xf32> to vector<16x1xf32>
    %110 = vector.broadcast %109 : vector<16x1xf32> to vector<16x16xf32>
    %111 = arith.subf %107, %110 : vector<16x16xf32>
    %112 = math.exp %111 : vector<16x16xf32>
    %cst_32 = arith.constant dense<0.000000e+00> : vector<16xf32>
    %113 = vector.multi_reduction <add>, %112, %cst_32 [1] : vector<16x16xf32> to vector<16xf32>
    %114 = vector.shape_cast %113 : vector<16xf32> to vector<16x1xf32>
    %115 = tpu.reciprocal %114 {approx = true} : vector<16x1xf32> -> vector<16x1xf32>
    %116 = vector.broadcast %115 : vector<16x1xf32> to vector<16x16xf32>
    %117 = arith.mulf %112, %116 : vector<16x16xf32>
    %cst_33 = arith.constant dense<0.000000e+00> : vector<16x8xf32>
    %118 = tpu.matmul %117, %105, %cst_33 {dimension_numbers = #tpu.dot_dimension_numbers<[1], [0], [0], [1], [0, 0, 1, 1], [], []>} : vector<16x16xf32>, vector<16x8xf32>, vector<16x8xf32> -> vector<16x8xf32>
    %119 = tpu.concatenate %70, %86, %102, %118 in 1 : vector<16x8xf32>, vector<16x8xf32>, vector<16x8xf32>, vector<16x8xf32> -> vector<16x32xf32>
    %c0_34 = arith.constant 0 : index
    %c0_35 = arith.constant 0 : index
    %120 = vector.load %arg2[%c0_34, %c0_35] : memref<32x32xf32, #tpu.memory_space<vmem>>, vector<32x32xf32>
    %cst_36 = arith.constant dense<0.000000e+00> : vector<16x32xf32>
    %121 = tpu.matmul %119, %120, %cst_36 {dimension_numbers = #tpu.dot_dimension_numbers<[1], [0], [0], [1], [0, 0, 1, 1], [], []>} : vector<16x32xf32>, vector<32x32xf32>, vector<16x32xf32> -> vector<16x32xf32>
    %122 = vector.extract_strided_slice %1 {offsets = [1, 0], sizes = [1, 32], strides = [1, 1]} : vector<9x128xf32> to vector<1x32xf32>
    %123 = vector.broadcast %122 : vector<1x32xf32> to vector<16x32xf32>
    %124 = arith.addf %121, %123 : vector<16x32xf32>
    %125 = arith.addf %0, %124 : vector<16x32xf32>
    %126 = vector.extract_strided_slice %1 {offsets = [2, 0], sizes = [1, 32], strides = [1, 1]} : vector<9x128xf32> to vector<1x32xf32>
    %127 = vector.extract_strided_slice %1 {offsets = [3, 0], sizes = [1, 32], strides = [1, 1]} : vector<9x128xf32> to vector<1x32xf32>
    %cst_37 = arith.constant dense<0.000000e+00> : vector<16xf32>
    %128 = vector.multi_reduction <add>, %125, %cst_37 [1] : vector<16x32xf32> to vector<16xf32>
    %129 = vector.shape_cast %128 : vector<16xf32> to vector<16x1xf32>
    %cst_38 = arith.constant 3.200000e+01 : f32
    %130 = vector.broadcast %cst_38 : f32 to vector<16x1xf32>
    %131 = arith.divf %129, %130 : vector<16x1xf32>
    %132 = vector.broadcast %131 : vector<16x1xf32> to vector<16x32xf32>
    %133 = arith.subf %125, %132 : vector<16x32xf32>
    %134 = arith.mulf %133, %133 : vector<16x32xf32>
    %cst_39 = arith.constant dense<0.000000e+00> : vector<16xf32>
    %135 = vector.multi_reduction <add>, %134, %cst_39 [1] : vector<16x32xf32> to vector<16xf32>
    %136 = vector.shape_cast %135 : vector<16xf32> to vector<16x1xf32>
    %cst_40 = arith.constant 3.200000e+01 : f32
    %137 = vector.broadcast %cst_40 : f32 to vector<16x1xf32>
    %138 = arith.divf %136, %137 : vector<16x1xf32>
    %139 = vector.broadcast %131 : vector<16x1xf32> to vector<16x32xf32>
    %140 = arith.subf %125, %139 : vector<16x32xf32>
    %cst_41 = arith.constant 9.99999974E-6 : f32
    %141 = vector.broadcast %cst_41 : f32 to vector<16x1xf32>
    %142 = arith.addf %138, %141 : vector<16x1xf32>
    %143 = math.rsqrt %142 : vector<16x1xf32>
    %144 = vector.broadcast %143 : vector<16x1xf32> to vector<16x32xf32>
    %145 = arith.mulf %140, %144 : vector<16x32xf32>
    %146 = vector.broadcast %126 : vector<1x32xf32> to vector<16x32xf32>
    %147 = arith.mulf %145, %146 : vector<16x32xf32>
    %148 = vector.broadcast %127 : vector<1x32xf32> to vector<16x32xf32>
    %149 = arith.addf %147, %148 : vector<16x32xf32>
    %c0_42 = arith.constant 0 : index
    %c0_43 = arith.constant 0 : index
    %150 = vector.load %arg3[%c0_42, %c0_43] : memref<32x64xf32, #tpu.memory_space<vmem>>, vector<32x64xf32>
    %cst_44 = arith.constant dense<0.000000e+00> : vector<16x64xf32>
    %151 = tpu.matmul %149, %150, %cst_44 {dimension_numbers = #tpu.dot_dimension_numbers<[1], [0], [0], [1], [0, 0, 1, 1], [], []>} : vector<16x32xf32>, vector<32x64xf32>, vector<16x64xf32> -> vector<16x64xf32>
    %152 = vector.extract_strided_slice %1 {offsets = [4, 0], sizes = [1, 64], strides = [1, 1]} : vector<9x128xf32> to vector<1x64xf32>
    %153 = vector.broadcast %152 : vector<1x64xf32> to vector<16x64xf32>
    %154 = arith.addf %151, %153 : vector<16x64xf32>
    %cst_45 = arith.constant 0.000000e+00 : f32
    %155 = vector.broadcast %cst_45 : f32 to vector<16x64xf32>
    %156 = arith.maximumf %154, %155 : vector<16x64xf32>
    %c0_46 = arith.constant 0 : index
    %c0_47 = arith.constant 0 : index
    %157 = vector.load %arg4[%c0_46, %c0_47] : memref<64x32xf32, #tpu.memory_space<vmem>>, vector<64x32xf32>
    %cst_48 = arith.constant dense<0.000000e+00> : vector<16x32xf32>
    %158 = tpu.matmul %156, %157, %cst_48 {dimension_numbers = #tpu.dot_dimension_numbers<[1], [0], [0], [1], [0, 0, 1, 1], [], []>} : vector<16x64xf32>, vector<64x32xf32>, vector<16x32xf32> -> vector<16x32xf32>
    %159 = vector.extract_strided_slice %1 {offsets = [5, 0], sizes = [1, 32], strides = [1, 1]} : vector<9x128xf32> to vector<1x32xf32>
    %160 = vector.broadcast %159 : vector<1x32xf32> to vector<16x32xf32>
    %161 = arith.addf %158, %160 : vector<16x32xf32>
    %162 = arith.addf %149, %161 : vector<16x32xf32>
    %163 = vector.extract_strided_slice %1 {offsets = [6, 0], sizes = [1, 32], strides = [1, 1]} : vector<9x128xf32> to vector<1x32xf32>
    %164 = vector.extract_strided_slice %1 {offsets = [7, 0], sizes = [1, 32], strides = [1, 1]} : vector<9x128xf32> to vector<1x32xf32>
    %cst_49 = arith.constant dense<0.000000e+00> : vector<16xf32>
    %165 = vector.multi_reduction <add>, %162, %cst_49 [1] : vector<16x32xf32> to vector<16xf32>
    %166 = vector.shape_cast %165 : vector<16xf32> to vector<16x1xf32>
    %cst_50 = arith.constant 3.200000e+01 : f32
    %167 = vector.broadcast %cst_50 : f32 to vector<16x1xf32>
    %168 = arith.divf %166, %167 : vector<16x1xf32>
    %169 = vector.broadcast %168 : vector<16x1xf32> to vector<16x32xf32>
    %170 = arith.subf %162, %169 : vector<16x32xf32>
    %171 = arith.mulf %170, %170 : vector<16x32xf32>
    %cst_51 = arith.constant dense<0.000000e+00> : vector<16xf32>
    %172 = vector.multi_reduction <add>, %171, %cst_51 [1] : vector<16x32xf32> to vector<16xf32>
    %173 = vector.shape_cast %172 : vector<16xf32> to vector<16x1xf32>
    %cst_52 = arith.constant 3.200000e+01 : f32
    %174 = vector.broadcast %cst_52 : f32 to vector<16x1xf32>
    %175 = arith.divf %173, %174 : vector<16x1xf32>
    %176 = vector.broadcast %168 : vector<16x1xf32> to vector<16x32xf32>
    %177 = arith.subf %162, %176 : vector<16x32xf32>
    %cst_53 = arith.constant 9.99999974E-6 : f32
    %178 = vector.broadcast %cst_53 : f32 to vector<16x1xf32>
    %179 = arith.addf %175, %178 : vector<16x1xf32>
    %180 = math.rsqrt %179 : vector<16x1xf32>
    %181 = vector.broadcast %180 : vector<16x1xf32> to vector<16x32xf32>
    %182 = arith.mulf %177, %181 : vector<16x32xf32>
    %183 = vector.broadcast %163 : vector<1x32xf32> to vector<16x32xf32>
    %184 = arith.mulf %182, %183 : vector<16x32xf32>
    %185 = vector.broadcast %164 : vector<1x32xf32> to vector<16x32xf32>
    %186 = arith.addf %184, %185 : vector<16x32xf32>
    %cst_54 = arith.constant 0.000000e+00 : f32
    %187 = vector.broadcast %cst_54 : f32 to vector<1x32xf32>
    %188 = vector.extract_strided_slice %186 {offsets = [0, 0], sizes = [15, 32], strides = [1, 1]} : vector<16x32xf32> to vector<15x32xf32>
    %189 = tpu.concatenate %187, %188 in 0 : vector<1x32xf32>, vector<15x32xf32> -> vector<16x32xf32>
    %190 = vector.broadcast %45 : vector<16x1xf32> to vector<16x32xf32>
    %191 = arith.mulf %189, %190 : vector<16x32xf32>
    %192 = vector.extract_strided_slice %186 {offsets = [1, 0], sizes = [15, 32], strides = [1, 1]} : vector<16x32xf32> to vector<15x32xf32>
    %193 = tpu.concatenate %192, %187 in 0 : vector<15x32xf32>, vector<1x32xf32> -> vector<16x32xf32>
    %194 = vector.broadcast %49 : vector<16x1xf32> to vector<16x32xf32>
    %195 = arith.mulf %193, %194 : vector<16x32xf32>
    %c1 = arith.constant 1 : index
    %c0_55 = arith.constant 0 : index
    %c0_56 = arith.constant 0 : index
    %196 = vector.load %arg5[%c1, %c0_55, %c0_56] : memref<3x32x32xf32, #tpu.memory_space<vmem>>, vector<1x32x32xf32>
    %197 = vector.shape_cast %196 : vector<1x32x32xf32> to vector<32x32xf32>
    %cst_57 = arith.constant dense<0.000000e+00> : vector<16x32xf32>
    %198 = tpu.matmul %186, %197, %cst_57 {dimension_numbers = #tpu.dot_dimension_numbers<[1], [0], [0], [1], [0, 0, 1, 1], [], []>} : vector<16x32xf32>, vector<32x32xf32>, vector<16x32xf32> -> vector<16x32xf32>
    %c0_58 = arith.constant 0 : index
    %c0_59 = arith.constant 0 : index
    %c0_60 = arith.constant 0 : index
    %199 = vector.load %arg5[%c0_58, %c0_59, %c0_60] : memref<3x32x32xf32, #tpu.memory_space<vmem>>, vector<1x32x32xf32>
    %200 = vector.shape_cast %199 : vector<1x32x32xf32> to vector<32x32xf32>
    %cst_61 = arith.constant dense<0.000000e+00> : vector<16x32xf32>
    %201 = tpu.matmul %191, %200, %cst_61 {dimension_numbers = #tpu.dot_dimension_numbers<[1], [0], [0], [1], [0, 0, 1, 1], [], []>} : vector<16x32xf32>, vector<32x32xf32>, vector<16x32xf32> -> vector<16x32xf32>
    %202 = arith.addf %198, %201 : vector<16x32xf32>
    %c2 = arith.constant 2 : index
    %c0_62 = arith.constant 0 : index
    %c0_63 = arith.constant 0 : index
    %203 = vector.load %arg5[%c2, %c0_62, %c0_63] : memref<3x32x32xf32, #tpu.memory_space<vmem>>, vector<1x32x32xf32>
    %204 = vector.shape_cast %203 : vector<1x32x32xf32> to vector<32x32xf32>
    %cst_64 = arith.constant dense<0.000000e+00> : vector<16x32xf32>
    %205 = tpu.matmul %195, %204, %cst_64 {dimension_numbers = #tpu.dot_dimension_numbers<[1], [0], [0], [1], [0, 0, 1, 1], [], []>} : vector<16x32xf32>, vector<32x32xf32>, vector<16x32xf32> -> vector<16x32xf32>
    %206 = arith.addf %202, %205 : vector<16x32xf32>
    %207 = vector.extract_strided_slice %1 {offsets = [8, 0], sizes = [1, 32], strides = [1, 1]} : vector<9x128xf32> to vector<1x32xf32>
    %208 = vector.broadcast %207 : vector<1x32xf32> to vector<16x32xf32>
    %209 = arith.addf %206, %208 : vector<16x32xf32>
    %cst_65 = arith.constant 0.000000e+00 : f32
    %210 = vector.broadcast %cst_65 : f32 to vector<16x32xf32>
    %211 = arith.maximumf %209, %210 : vector<16x32xf32>
    %c0_66 = arith.constant 0 : index
    %c0_67 = arith.constant 0 : index
    %212 = vector.load %arg7[%c0_66, %c0_67] : memref<16x32xf32, #tpu.memory_space<vmem>>, vector<16x32xf32>
    tpu.vector_store %arg7[%c0_66, %c0_67], %211 {strides = array<i32>} : memref<16x32xf32, #tpu.memory_space<vmem>>, vector<16x32xf32>,
    return
  }
}

</mosaic_0001>

<bundles_post_ra>
// kernel: transformer_encoder_conv_norm_relu.1
= control target key start
LH: loop header
LB: loop body
LE: loop exit
PB: predicated region body
PF: predicated region fallthrough
CT: control target
= control target key end

     0   :  { %12 = vsyncpa [#allocation3], 0  ;;  %s2706_s0 = inlined_call_operand.vmem [shape: f32[16,32], index: 0, kind: input, shape index: {}]   ;;  %s2707_s1 = inlined_call_operand.hbm [shape: f32[32,96], index: 1, kind: input, shape index: {}]   ;;  %s2708_s2 = inlined_call_operand.hbm [shape: f32[32,32], index: 2, kind: input, shape index: {}]   ;;  %s2709_s3 = inlined_call_operand.hbm [shape: f32[32,64], index: 3, kind: input, shape index: {}]   ;;  %s2710_s4 = inlined_call_operand.vmem [shape: f32[64,32], index: 4, kind: input, shape index: {}]   ;;  %s2711_s5 = inlined_call_operand.vmem [shape: f32[3,32,32], index: 5, kind: input, shape index: {}]   ;;  %s2712_s6 = inlined_call_operand.hbm [shape: f32[9,128], index: 6, kind: input, shape index: {}]   ;;  %s2713_s7 = inlined_call_operand.hbm [shape: f32[16,32], index: 7, kind: output, shape index: {}]  }
   0x1   :  { %13 = vsyncpa [#allocation6], 0 }
   0x2   :  { %14 = vsyncpa [#allocation9], 0 }
   0x3   :  { %15 = vsyncpa [#allocation4], 0  ;;  %s2323_s24 = smov [#allocation5]   ;;  %s2324_s26 = smov [#allocation2]  }
   0x4   :  { %s35_s25 = sshll.u32 %s2323_s24, 4  ;;  %s23_s27 = sshll.u32 %s2324_s26, 4  ;;  %s36_s25 = int_to_ptr.vmem [resolvable:$true] %s35_s25  ;;  %s2385_s27 = int_to_ptr.vmem [resolvable:$true] %s23_s27 }
   0x5   :  { %s2205_s30 = scalar_lea.hbm %s2708_s2, 512 }
   0x6   :  { %p2206_p0 = scmp.ne.s32.totalorder %s2708_s2, %s2205_s30  ;;  %p2209_p1 = scmp.lt.u32.totalorder %s2205_s30, %s2708_s2 }
   0x8   :  { %p2211_p2 = pnand %p2209_p1, %p2206_p0 }
   0xa   :  { %2214 = shalt.err (!%p2211_p2)
}
   0xb   :  { %s2215_s12 = scalar_lea.vmem %s36_s25, 512  ;;  %p2220_p4 = scmp.lt.s32.totalorder %s36_s25, %s36_s25 }
   0xc   :  { %p2216_p3 = scmp.ne.s32.totalorder %s36_s25, %s2215_s12  ;;  %p2221_p5 = scmp.lt.s32.totalorder %s2215_s12, %s2215_s12 }
   0xe   :  { %p2222_p6 = por %p2221_p5, %p2220_p4 }
  0x10   :  { %p2223_p7 = pnand %p2222_p6, %p2216_p3 }
  0x12   :  { %2226 = shalt.err (!%p2223_p7)
}
  0x13   :  { %s2325_s13 = smov 128   ;;  %s2326_s14 = smov 8  }
  0x14   :  { %41 = dma.hbm_to_vmem [thread:$0]  %s2708_s2, 512, %s36_s25, [#allocation6], %s2325_s13, %s2325_s13, %s2326_s14  }
  0x15   :  { %s2227_s19 = scalar_lea.hbm %s2707_s1, 512 }
  0x16   :  { %p2228_p8 = scmp.ne.s32.totalorder %s2707_s1, %s2227_s19  ;;  %p2231_p9 = scmp.lt.u32.totalorder %s2227_s19, %s2707_s1 }
  0x18   :  { %p2233_p10 = pnand %p2231_p9, %p2228_p8 }
  0x1a   :  { %2236 = shalt.err (!%p2233_p10)
}
  0x1b   :  { %s2237_s24 = scalar_lea.vmem %s2385_s27, 512  ;;  %p2242_p12 = scmp.lt.s32.totalorder %s2385_s27, %s2385_s27 }
  0x1c   :  { %p2238_p11 = scmp.ne.s32.totalorder %s2385_s27, %s2237_s24  ;;  %p2243_p13 = scmp.lt.s32.totalorder %s2237_s24, %s2237_s24 }
  0x1e   :  { %p2244_p0 = por %p2243_p13, %p2242_p12 }
  0x20   :  { %p2245_p1 = pnand %p2244_p0, %p2238_p11 }
  0x22   :  { %2248 = shalt.err (!%p2245_p1)
}
  0x23   :  { %29 = dma.hbm_to_vmem [thread:$0]  %s2707_s1, 512, %s2385_s27, [#allocation3], %s2325_s13, %s2325_s13, %s2326_s14  }
  0x24   :  { %s2327_s26 = smov [#allocation7]   ;;  %s2328_s29 = smov [#allocation8]  }
  0x25   :  { %s47_s28 = sshll.u32 %s2327_s26, 4  ;;  %s63_s30 = sshll.u32 %s2328_s29, 4  ;;  %s48_s28 = int_to_ptr.vmem [resolvable:$true] %s47_s28  ;;  %s2422_s30 = int_to_ptr.vmem [resolvable:$true] %s63_s30 }
  0x26   :  { %s2249_s10 = scalar_lea.hbm %s2709_s3, 512 }
  0x27   :  { %p2250_p2 = scmp.ne.s32.totalorder %s2709_s3, %s2249_s10  ;;  %p2253_p3 = scmp.lt.u32.totalorder %s2249_s10, %s2709_s3 }
  0x29   :  { %p2255_p4 = pnand %p2253_p3, %p2250_p2 }
  0x2b   :  { %2258 = shalt.err (!%p2255_p4)
}
  0x2c   :  { %s2259_s1 = scalar_lea.vmem %s48_s28, 512  ;;  %p2264_p6 = scmp.lt.s32.totalorder %s48_s28, %s48_s28 }
  0x2d   :  { %p2260_p5 = scmp.ne.s32.totalorder %s48_s28, %s2259_s1  ;;  %p2265_p7 = scmp.lt.s32.totalorder %s2259_s1, %s2259_s1 }
  0x2f   :  { %p2266_p8 = por %p2265_p7, %p2264_p6 }
  0x31   :  { %p2267_p9 = pnand %p2266_p8, %p2260_p5 }
  0x33   :  { %2270 = shalt.err (!%p2267_p9)
}
  0x34   :  { %53 = dma.hbm_to_vmem [thread:$0]  %s2709_s3, 512, %s48_s28, [#allocation6], %s2325_s13, %s2325_s13, %s2326_s14  }
  0x35   :  { %s2271_s20 = scalar_lea.hbm %s2712_s6, 256 }
  0x36   :  { %p2272_p10 = scmp.ne.s32.totalorder %s2712_s6, %s2271_s20  ;;  %p2275_p11 = scmp.lt.u32.totalorder %s2271_s20, %s2712_s6 }
  0x38   :  { %p2277_p12 = pnand %p2275_p11, %p2272_p10 }
  0x3a   :  { %2280 = shalt.err (!%p2277_p12)
}
  0x3b   :  { %s2281_s2 = scalar_lea.vmem %s2422_s30, 256  ;;  %p2286_p0 = scmp.lt.s32.totalorder %s2422_s30, %s2422_s30 }
  0x3c   :  { %p2282_p13 = scmp.ne.s32.totalorder %s2422_s30, %s2281_s2  ;;  %p2287_p1 = scmp.lt.s32.totalorder %s2281_s2, %s2281_s2 }
  0x3e   :  { %p2288_p2 = por %p2287_p1, %p2286_p0 }
  0x40   :  { %p2289_p3 = pnand %p2288_p2, %p2282_p13 }
  0x42   :  { %2292 = shalt.err (!%p2289_p3)
}
  0x43   :  { %69 = dma.hbm_to_vmem [thread:$0]  %s2712_s6, 256, %s2422_s30, [#allocation9], %s2325_s13, %s2325_s13, %s2326_s14  }
  0x44   :  { %2315 = dma.done.wait [#allocation3], 512  }
  0x45   :  { %2316 = vsyncadd [#allocation3], 4294966784 }
  0x46   :  { %2317 = dma.done.wait [#allocation6], 1024  }
  0x47   :  { %2318 = vsyncadd [#allocation6], 4294966272 }
  0x48   :  { %2319 = dma.done.wait [#allocation9], 256  }
  0x49   :  { %2320 = vsyncadd [#allocation9], 4294967040  ;;  %vm151_vm0 = vcmask 261120   ;;  %v143_v0 = vld [vmem:[#allocation2] sm:$0xff]  ;;  %v144_v1 = vld [vmem:[#allocation2 + $0x8] sm:$0xff]  ;;  %v86_v8 = vlaneseq  ;;  %vm239_vm1 = vcmask 64512  }
  0x4a   :  { %v145_v2 = vld [vmem:[#allocation2 + $0x10] sm:$0xff]  ;;  %v1995_v3 = vpack.c.bf16 %v144_v1, %v143_v0  ;;  %v146_v4 = vld [vmem:[#allocation2 + $0x18] sm:$0xff]  ;;  %v2462_v5 = vld [vmem:[%s2706_s0] sm:$0xff]  ;;  %s2330_s30 = smov 96   ;;  %s2331_s8 = smov 88   ;;  %vm323_vm5 = vcmask 130048  }
  0x4b   :  { %v1999_v6 = vpack.c.bf16 %v146_v4, %v145_v2  ;;  %1862 = vmatprep.mubr.msk.f32.mxu0 %vm151_vm0, %v2462_v5  ;;  %v2469_v7 = vld [vmem:[%s2706_s0 + $0x8] sm:$0xff]  ;;  %v2473_v9 = vshrl.u32 %v86_v8, 7  ;;  %v2476_v11 = vld [vmem:[#allocation8] sm:$0xff]  ;;  %s2329_s0 = smov 120   ;;  %vm2495_vm2 = vmpackc.low %vm239_vm1, %vm239_vm1  ;;  %v114_v30 = vand.u32 127, %v86_v8  ;;  %s2333_s9 = smov 64  }
  0x4c   :  { %1996 = vmatprep.subr.bf16.mxu0 %v1995_v3  ;;  %v2332_v34 = vmov -1e+30   ;;  %s2334_s10 = smov 80   ;;  %s2335_s11 = smov 72   ;;  %vm1061_vm6 = vcmask 195584   ;;  %vm1297_vm7 = vcmask 523264  }
  0x4d   :  { %1998 = vmatpush3.bf16.msra.mxu0 %v1995_v3  ;;  %v149_v10 = vsub.s32 0, %v2473_v9  ;;  %v88_v29 = vadd.s32 8, %v2473_v9  ;;  %v119_v32 = vand.u32 1, %v114_v30  ;;  %v2515_v33 = vand.u32 1, %v2473_v9  ;;  %s2336_s12 = smov 56   ;;  %s2337_s15 = smov 112  }
  0x4e   :  { %2000 = vmatprep.subr.bf16.mxu0 %v1999_v6  ;;  %s2338_s16 = smov 104   ;;  %s2339_s1 = smov 48   ;;  %vm1421_vm10 = vcmask 1040384   ;;  %vm1430_vm12 = vcmask 1046528  }
  0x4f   :  { %v150_v12 = vrot.slane %v2476_v11, %v149_v10  ;;  %v2512_v31 = vand.u32 1, %v88_v29  ;;  %vm127_vm4 = vcmp.eq.s32.totalorder %v2515_v33, %v119_v32  ;;  %s2340_s27 = smov 40   ;;  %s2341_s17 = smov 16   ;;  %vm131_vm8 = vcmp.ne.s32.totalorder %v2515_v33, 0 }
  0x50   :  { %v2521_v36 = vsel %vm127_vm4, 0.0, %v2332_v34  ;;  %s2342_s18 = smov 24   ;;  %vm137_vm11 = vcmp.ne.s32.totalorder %v2515_v33, 1 }
  0x51   :  { %2002 = vmatpush3.bf16.msra.mxu0 %v1999_v6  ;;  %vm128_vm3 = vcmp.eq.s32.totalorder %v2512_v31, %v119_v32  ;;  %vm132_vm9 = vcmp.ne.s32.totalorder %v2512_v31, 0  ;;  %vm138_vm13 = vcmp.ne.s32.totalorder %v2512_v31, 1 }
  0x52   :  { %v2519_v35 = vsel %vm128_vm3, 0.0, %v2332_v34 }
  0x54   :  { %1863 = vmatmul.mubr.msk.f32.vlgmr.msra.gmra.mrb[0].mxu0 %vm151_vm0, %v2469_v7 }
 0x127   :  { %v1864_v13 = vpop.f32.mrb[0].mxu0 }
 0x128   :  { %v2479_v14 = vadd.f32 %v1864_v13, %v150_v12  ;;  %v224_v15 = vpop.f32.mrb[1].mxu0 }
 0x129   :  { %v2481_v16 = vadd.f32 %v224_v15, %v150_v12 }
 0x12b   :  { %433 = vrot.lane.b32.xlu1 %v2481_v16, %s2329_s0  ;;  %1869 = vmatprep.mubr.msk.f32.mxu1 %vm239_vm1, %v2481_v16  ;;  %v2488_v17 = vpack.i.bf16 %v2479_v14, %v2481_v16 }
 0x12d   :  { %2126 = vrot.lane.b32.xlu0 %v2488_v17, %s2330_s30 }
 0x12f   :  { %435 = vrot.lane.b32.xlu1 %v2479_v14, %s2329_s0 }
 0x131   :  { %2131 = vrot.lane.b32.xlu0 %v2488_v17, %s2331_s8 }
 0x19d   :  { %v434_v27 = vpop.permute.xlu1 %433 }
 0x19f   :  { %v2127_v18 = vpop.permute.xlu0 %2126 }
 0x1a0   :  { %v2129_v19 = vunpack.i.h.bf16 %v2127_v18  ;;  %v2128_v20 = vunpack.i.l.bf16 %v2127_v18 }
 0x1a1   :  { %v436_v28 = vpop.permute.xlu1 %435 }
 0x1a2   :  { %v2003_v22 = vpack.c.bf16 %v2129_v19, %v2128_v20 }
 0x1a3   :  { %v2132_v23 = vpop.permute.xlu0 %2131 }
 0x1a4   :  { %v2134_v24 = vunpack.i.h.bf16 %v2132_v23  ;;  %v2133_v25 = vunpack.i.l.bf16 %v2132_v23  ;;  %2005 = vmatprep.subr.msk.bf16.mxu1 %vm2495_vm2, %v2003_v22 }
 0x1a5   :  { %2008 = vmatpush3.bf16.xpose.msk.msra.mxu1 %vm2495_vm2, %v2003_v22 }
 0x1a6   :  { %v2013_v26 = vpack.c.bf16 %v2134_v24, %v2133_v25 }
 0x1a8   :  { %2015 = vmatprep.subr.msk.bf16.mxu1 %vm2495_vm2, %v2013_v26 }
 0x1ac   :  { %1870 = vmatmul.mubr.msk.f32.vlgmr.msra.gmra.mrb[0].mxu1 %vm239_vm1, %v2479_v14 }
 0x1ad   :  { %2018 = vmatpush3.bf16.xpose.msk.msra.mxu1 %vm2495_vm2, %v2013_v26  ;;  %1883 = vmatprep.mubr.msk.f32.mxu1 %vm239_vm1, %v434_v27 }
 0x1b4   :  { %1884 = vmatmul.mubr.msk.f32.vlgmr.msra.gmra.mrb[2].mxu1 %vm239_vm1, %v436_v28 }
 0x27f   :  { %v1871_v37 = vpop.f32.mrb[0].mxu1 }
 0x280   :  { %v320_v38 = vadd.f32 %v1871_v37, %v2519_v35  ;;  %v314_v39 = vpop.f32.mrb[1].mxu1 }
 0x281   :  { %v315_v40 = vadd.f32 %v314_v39, %v2521_v36 }
 0x282   :  { %v327_v41 = vsel %vm323_vm5, %v320_v38, -inf }
 0x283   :  { %328 = vmax.xlane.f32.xlu1 %v327_v41  ;;  %v324_v42 = vsel %vm323_vm5, %v315_v40, -inf }
 0x284   :  { %325 = vmax.xlane.f32.xlu0 %v324_v42 }
 0x287   :  { %v1885_v43 = vpop.f32.mrb[2].mxu1 }
 0x288   :  { %v515_v44 = vpop.f32.mrb[3].mxu1  ;;  %v521_v46 = vadd.f32 %v1885_v43, %v2519_v35 }
 0x289   :  { %v516_v45 = vadd.f32 %v515_v44, %v2521_v36 }
 0x28a   :  { %v527_v48 = vsel %vm323_vm5, %v521_v46, -inf }
 0x28b   :  { %v524_v47 = vsel %vm323_vm5, %v516_v45, -inf }
 0x28c   :  { %525 = vmax.xlane.f32.xlu0 %v524_v47 }
 0x290   :  { %528 = vmax.xlane.f32.xlu0 %v527_v48 }
 0x294   :  { %2136 = vrot.lane.b32.xlu1 %v2488_v17, %s2333_s9 }
 0x310   :  { %v329_v49 = vpop.xlane.xlu1 %328 }
 0x311   :  { %v331_v50 = vsub.f32 %v320_v38, %v329_v49  ;;  %v326_v51 = vpop.xlane.xlu0 %325 }
 0x312   :  { %v330_v52 = vsub.f32 %v315_v40, %v326_v51 }
 0x313   :  { %v334_v53 = vmul.f32 1.442695, %v331_v50 }
 0x314   :  { %v332_v54 = vmul.f32 1.442695, %v330_v52  ;;  %v2137_v55 = vpop.permute.xlu1 %2136 }
 0x315   :  { %2165 = vpow2.f32 %v334_v53  ;;  %v2139_v56 = vunpack.i.h.bf16 %v2137_v55  ;;  %v2138_v57 = vunpack.i.l.bf16 %v2137_v55 }
 0x316   :  { %2167 = vpow2.f32 %v332_v54 }
 0x317   :  { %v2009_v58 = vpack.c.bf16 %v2139_v56, %v2138_v57 }
 0x319   :  { %2010 = vmatprep.subr.bf16.mxu0 %v2009_v58  ;;  %v526_v59 = vpop.xlane.xlu0 %525 }
 0x31a   :  { %2012 = vmatpush3.bf16.msra.mxu0 %v2009_v58  ;;  %v530_v6 = vsub.f32 %v516_v45, %v526_v59 }
 0x31c   :  { %v532_v8 = vmul.f32 1.442695, %v530_v6 }
 0x31d   :  { %v529_v60 = vpop.xlane.xlu0 %528 }
 0x31e   :  { %v531_v61 = vsub.f32 %v521_v46, %v529_v60 }
 0x31f   :  { %v2166_v62 = vpop.eup %2165 }
 0x320   :  { %v2168_v63 = vpop.eup %2167  ;;  %v534_v0 = vmul.f32 1.442695, %v531_v61  ;;  %v339_v1 = vsel %vm323_vm5, %v2166_v62, 0.0 }
 0x321   :  { %340 = vadd.xlane.f32.xlu0 %v339_v1  ;;  %v336_v2 = vsel %vm323_vm5, %v2168_v63, 0.0 }
 0x322   :  { %2169 = vpow2.f32 %v534_v0  ;;  %337 = vadd.xlane.f32.xlu1 %v336_v2 }
 0x323   :  { %2171 = vpow2.f32 %v532_v8 }
 0x32c   :  { %v2170_v3 = vpop.eup %2169 }
 0x32d   :  { %v539_v4 = vsel %vm323_vm5, %v2170_v3, 0.0  ;;  %v2172_v10 = vpop.eup %2171 }
 0x32e   :  { %540 = vadd.xlane.f32.xlu0 %v539_v4  ;;  %v536_v12 = vsel %vm323_vm5, %v2172_v10, 0.0 }
 0x333   :  { %2146 = vrot.lane.b32.xlu1 %v2488_v17, %s2334_s10 }
 0x337   :  { %2151 = vrot.lane.b32.xlu1 %v2488_v17, %s2335_s11 }
 0x344   :  { %2141 = vrot.lane.b32.xlu0 %v2488_v17, %s2336_s12 }
 0x348   :  { %633 = vrot.lane.b32.xlu0 %v2481_v16, %s2337_s15 }
 0x34c   :  { %833 = vrot.lane.b32.xlu0 %v2481_v16, %s2338_s16 }
 0x35b   :  { %537 = vadd.xlane.f32.xlu1 %v536_v12 }
 0x36c   :  { %635 = vrot.lane.b32.xlu1 %v2479_v14, %s2337_s15 }
 0x370   :  { %835 = vrot.lane.b32.xlu1 %v2479_v14, %s2338_s16 }
 0x3ae   :  { %v341_v13 = vpop.xlane.xlu0 %340 }
 0x3af   :  { %2173 = vrcp.f32 %v341_v13  ;;  %v338_v15 = vpop.xlane.xlu1 %337 }
 0x3b0   :  { %2175 = vrcp.f32 %v338_v15 }
 0x3b3   :  { %v2147_v18 = vpop.permute.xlu1 %2146 }
 0x3b4   :  { %v2149_v28 = vunpack.i.h.bf16 %v2147_v18  ;;  %v2148_v29 = vunpack.i.l.bf16 %v2147_v18 }
 0x3b6   :  { %v2023_v38 = vpack.c.bf16 %v2149_v28, %v2148_v29 }
 0x3b7   :  { %v2152_v19 = vpop.permute.xlu1 %2151 }
 0x3b8   :  { %v2154_v20 = vunpack.i.h.bf16 %v2152_v19  ;;  %v2153_v22 = vunpack.i.l.bf16 %v2152_v19 }
 0x3b9   :  { %v2174_v23 = vpop.eup %2173 }
 0x3ba   :  { %v2176_v24 = vpop.eup %2175  ;;  %v2033_v16 = vpack.c.bf16 %v2154_v20, %v2153_v22  ;;  %v345_v27 = vmul.f32 %v2174_v23, %v2166_v62 }
 0x3bb   :  { %v541_v25 = vpop.xlane.xlu0 %540  ;;  %v344_v26 = vmul.f32 %v2176_v24, %v2168_v63 }
 0x3bc   :  { %2035 = vmatprep.subr.msk.bf16.mxu1 %vm2495_vm2, %v2033_v16  ;;  %2177 = vrcp.f32 %v541_v25 }
 0x3bd   :  { %1876 = vmatprep.mubr.msk.f32.mxu0 %vm323_vm5, %v344_v26  ;;  %2038 = vmatpush3.bf16.xpose.msk.msra.mxu1 %vm2495_vm2, %v2033_v16 }
 0x3be   :  { %1877 = vmatmul.mubr.msk.f32.vlgmr.msra.gmra.mrb[2].mxu0 %vm323_vm5, %v345_v27 }
 0x3bf   :  { %v2142_v14 = vpop.permute.xlu0 %2141 }
 0x3c0   :  { %v2144_v30 = vunpack.i.h.bf16 %v2142_v14  ;;  %v2143_v32 = vunpack.i.l.bf16 %v2142_v14 }
 0x3c2   :  { %v2019_v34 = vpack.c.bf16 %v2144_v30, %v2143_v32 }
 0x3c3   :  { %v634_v37 = vpop.permute.xlu0 %633 }
 0x3c4   :  { %2020 = vmatprep.subr.bf16.mxu0 %v2019_v34 }
 0x3c5   :  { %2022 = vmatpush3.bf16.msra.mxu0 %v2019_v34 }
 0x3c6   :  { %2025 = vmatprep.subr.msk.bf16.mxu0 %vm2495_vm2, %v2023_v38  ;;  %v2178_v43 = vpop.eup %2177 }
 0x3c7   :  { %v834_v39 = vpop.permute.xlu0 %833  ;;  %v545_v46 = vmul.f32 %v2178_v43, %v2170_v3 }
 0x3c8   :  { %1911 = vmatprep.mubr.msk.f32.mxu1 %vm239_vm1, %v834_v39 }
 0x3e8   :  { %v538_v40 = vpop.xlane.xlu1 %537 }
 0x3e9   :  { %2179 = vrcp.f32 %v538_v40 }
 0x3ec   :  { %v636_v41 = vpop.permute.xlu1 %635 }
 0x3f0   :  { %v836_v42 = vpop.permute.xlu1 %835 }
 0x3f1   :  { %1912 = vmatmul.mubr.msk.f32.vlgmr.msra.gmra.mrb[4].mxu1 %vm239_vm1, %v836_v42 }
 0x3f3   :  { %v2180_v44 = vpop.eup %2179 }
 0x3f4   :  { %v544_v45 = vmul.f32 %v2180_v44, %v2172_v10 }
 0x3f6   :  { %1890 = vmatprep.mubr.msk.f32.mxu0 %vm323_vm5, %v544_v45  ;;  %v1064_v45 = vld [vmem:[#allocation5] sm:$0xff] }
 0x3f7   :  { %1891 = vmatmul.mubr.msk.f32.vlgmr.msra.gmra.mrb[4].mxu0 %vm323_vm5, %v545_v46  ;;  %v1065_v46 = vld [vmem:[#allocation5 + $0x8] sm:$0xff] }
 0x3f8   :  { %2028 = vmatpush3.bf16.xpose.msk.msra.mxu0 %vm2495_vm2, %v2023_v38  ;;  %1897 = vmatprep.mubr.msk.f32.mxu0 %vm239_vm1, %v634_v37 }
 0x3ff   :  { %1898 = vmatmul.mubr.msk.f32.vlgmr.msra.gmra.mrb[6].mxu0 %vm239_vm1, %v636_v41 }
 0x491   :  { %v2559_v47 = vpop.f32.mrb[2].mxu0 }
 0x492   :  { %v2561_v48 = vpop.f32.mrb[3].mxu0 }
 0x4c4   :  { %v1913_v49 = vpop.f32.mrb[4].mxu1 }
 0x4c5   :  { %v915_v50 = vpop.f32.mrb[5].mxu1  ;;  %v921_v59 = vadd.f32 %v1913_v49, %v2519_v35  ;;  %v2043_v49 = vpack.c.bf16 %v1065_v46, %v1064_v45 }
 0x4c6   :  { %v916_v57 = vadd.f32 %v915_v50, %v2521_v36  ;;  %v1066_v50 = vld [vmem:[#allocation5 + $0x10] sm:$0xff] }
 0x4c7   :  { %v927_v61 = vsel %vm323_vm5, %v921_v59, -inf }
 0x4c8   :  { %v924_v60 = vsel %vm323_vm5, %v916_v57, -inf }
 0x4ca   :  { %v1892_v51 = vpop.f32.mrb[4].mxu0 }
 0x4cb   :  { %v624_v52 = vpop.f32.mrb[5].mxu0 }
 0x4d2   :  { %v1899_v53 = vpop.f32.mrb[6].mxu0 }
 0x4d3   :  { %v721_v54 = vadd.f32 %v1899_v53, %v2519_v35  ;;  %v715_v55 = vpop.f32.mrb[7].mxu0 }
 0x4d4   :  { %v716_v56 = vadd.f32 %v715_v55, %v2521_v36 }
 0x4d5   :  { %v727_v21 = vsel %vm323_vm5, %v721_v54, -inf }
 0x4d6   :  { %728 = vmax.xlane.f32.xlu1 %v727_v21  ;;  %v724_v58 = vsel %vm323_vm5, %v716_v56, -inf }
 0x4d7   :  { %725 = vmax.xlane.f32.xlu0 %v724_v58 }
 0x4db   :  { %925 = vmax.xlane.f32.xlu0 %v924_v60 }
 0x4df   :  { %928 = vmax.xlane.f32.xlu0 %v927_v61 }
 0x563   :  { %v729_v0 = vpop.xlane.xlu1 %728 }
 0x564   :  { %v726_v62 = vpop.xlane.xlu0 %725  ;;  %v731_v3 = vsub.f32 %v721_v54, %v729_v0 }
 0x565   :  { %v730_v63 = vsub.f32 %v716_v56, %v726_v62 }
 0x566   :  { %v734_v10 = vmul.f32 1.442695, %v731_v3 }
 0x567   :  { %v732_v4 = vmul.f32 1.442695, %v730_v63 }
 0x568   :  { %v926_v1 = vpop.xlane.xlu0 %925 }
 0x569   :  { %v930_v2 = vsub.f32 %v916_v57, %v926_v1 }
 0x56b   :  { %v932_v36 = vmul.f32 1.442695, %v930_v2 }
 0x56c   :  { %v929_v6 = vpop.xlane.xlu0 %928 }
 0x56d   :  { %2181 = vpow2.f32 %v932_v36  ;;  %v931_v8 = vsub.f32 %v921_v59, %v929_v6 }
 0x56e   :  { %2183 = vpow2.f32 %v732_v4  ;;  %v1070_v4 = vsub.s32 1, %v2473_v9 }
 0x56f   :  { %v934_v35 = vmul.f32 1.442695, %v931_v8 }
 0x570   :  { %v1071_v36 = vrot.slane %v2476_v11, %v1070_v4 }
 0x571   :  { %2185 = vpow2.f32 %v934_v35 }
 0x572   :  { %2187 = vpow2.f32 %v734_v10 }
 0x577   :  { %v2182_v12 = vpop.eup %2181 }
 0x578   :  { %v936_v13 = vsel %vm323_vm5, %v2182_v12, 0.0  ;;  %v2184_v15 = vpop.eup %2183 }
 0x579   :  { %937 = vadd.xlane.f32.xlu1 %v936_v13  ;;  %v736_v19 = vsel %vm323_vm5, %v2184_v15, 0.0 }
 0x57b   :  { %v2186_v18 = vpop.eup %2185 }
 0x57c   :  { %v939_v20 = vsel %vm323_vm5, %v2186_v18, 0.0  ;;  %v2188_v22 = vpop.eup %2187 }
 0x57d   :  { %737 = vadd.xlane.f32.xlu1 %v736_v19  ;;  %940 = vadd.xlane.f32.xlu0 %v939_v20  ;;  %v739_v23 = vsel %vm323_vm5, %v2188_v22, 0.0 }
 0x581   :  { %740 = vadd.xlane.f32.xlu0 %v739_v23 }
 0x58e   :  { %2156 = vrot.lane.b32.xlu1 %v2488_v17, %s2339_s1 }
 0x592   :  { %1035 = vrot.lane.b32.xlu1 %v624_v52, %s2326_s14 }
 0x596   :  { %1037 = vrot.lane.b32.xlu1 %v1892_v51, %s2326_s14  ;;  %v1067_v51 = vld [vmem:[#allocation5 + $0x18] sm:$0xff] }
 0x597   :  { %2161 = vrot.lane.b32.xlu0 %v2488_v17, %s2340_s27  ;;  %v2047_v52 = vpack.c.bf16 %v1067_v51, %v1066_v50  ;;  %v1184_v50 = vsub.s32 2, %v2473_v9  ;;  %v1190_v51 = vsub.s32 3, %v2473_v9 }
 0x606   :  { %v938_v24 = vpop.xlane.xlu1 %937 }
 0x60a   :  { %v738_v16 = vpop.xlane.xlu1 %737  ;;  %v941_v25 = vpop.xlane.xlu0 %940 }
 0x60b   :  { %2189 = vrcp.f32 %v738_v16 }
 0x60c   :  { %2191 = vrcp.f32 %v938_v24 }
 0x60e   :  { %v2157_v26 = vpop.permute.xlu1 %2156  ;;  %v741_v27 = vpop.xlane.xlu0 %740 }
 0x60f   :  { %v2159_v14 = vunpack.i.h.bf16 %v2157_v26  ;;  %v2158_v28 = vunpack.i.l.bf16 %v2157_v26  ;;  %2193 = vrcp.f32 %v741_v27  ;;  %v1195_v26 = vld [vmem:[#allocation7 + $0x8] sm:$0xff] }
 0x610   :  { %2195 = vrcp.f32 %v941_v25 }
 0x611   :  { %v2029_v29 = vpack.c.bf16 %v2159_v14, %v2158_v28  ;;  %v1196_v14 = vld [vmem:[#allocation7 + $0x10] sm:$0xff]  ;;  %v1197_v28 = vld [vmem:[#allocation7 + $0x18] sm:$0xff] }
 0x612   :  { %v2162_v30 = vpop.permute.xlu0 %2161  ;;  %v1036_v21 = vpop.permute.xlu1 %1035 }
 0x613   :  { %v2164_v32 = vunpack.i.h.bf16 %v2162_v30  ;;  %v2163_v34 = vunpack.i.l.bf16 %v2162_v30  ;;  %2030 = vmatprep.subr.bf16.mxu0 %v2029_v29  ;;  %v1057_v60 = vsel %vm239_vm1, %v2561_v48, %v1036_v21  ;;  %v1285_v30 = vld [vmem:[%s2710_s4] sm:$0xff] }
 0x614   :  { %2032 = vmatpush3.bf16.msra.mxu0 %v2029_v29  ;;  %v2055_v29 = vpack.c.bf16 %v1197_v28, %v1196_v14  ;;  %v1444_v28 = vld [vmem:[%s2711_s5] sm:$0xff] }
 0x615   :  { %v2190_v37 = vpop.eup %2189  ;;  %v2039_v38 = vpack.c.bf16 %v2164_v32, %v2163_v34  ;;  %v1286_v32 = vld [vmem:[%s2710_s4 + $0x8] sm:$0xff]  ;;  %v1287_v34 = vld [vmem:[%s2710_s4 + $0x10] sm:$0xff] }
 0x616   :  { %v744_v17 = vmul.f32 %v2190_v37, %v2184_v15  ;;  %v2192_v39 = vpop.eup %2191  ;;  %v1038_v57 = vpop.permute.xlu1 %1037  ;;  %v2059_v37 = vpack.c.bf16 %v1286_v32, %v1285_v30  ;;  %v1446_v32 = vld [vmem:[%s2711_s5 + $0x10] sm:$0xff] }
 0x617   :  { %2040 = vmatprep.subr.bf16.mxu0 %v2039_v38  ;;  %v944_v43 = vmul.f32 %v2192_v39, %v2182_v12  ;;  %v1058_v62 = vsel %vm239_vm1, %v2559_v47, %v1038_v57  ;;  %v1289_v39 = vld [vmem:[%s2710_s4 + $0x20] sm:$0xff] }
 0x618   :  { %1904 = vmatprep.mubr.msk.f32.mxu0 %vm323_vm5, %v744_v17 }
 0x619   :  { %v2194_v40 = vpop.eup %2193 }
 0x61a   :  { %v745_v41 = vmul.f32 %v2194_v40, %v2188_v22  ;;  %v2196_v42 = vpop.eup %2195  ;;  %v1290_v40 = vld [vmem:[%s2710_s4 + $0x28] sm:$0xff] }
 0x61b   :  { %v945_v44 = vmul.f32 %v2196_v42, %v2186_v18 }
 0x61c   :  { %1905 = vmatmul.mubr.msk.f32.vlgmr.msra.gmra.mrb[8].mxu0 %vm323_vm5, %v745_v41  ;;  %v2067_v41 = vpack.c.bf16 %v1290_v40, %v1289_v39 }
 0x61d   :  { %2042 = vmatpush3.bf16.msra.mxu0 %v2039_v38  ;;  %1918 = vmatprep.mubr.msk.f32.mxu0 %vm323_vm5, %v944_v43  ;;  %v1288_v38 = vld [vmem:[%s2710_s4 + $0x18] sm:$0xff] }
 0x61e   :  { %2044 = vmatprep.subr.bf16.mxu0 %v2043_v49  ;;  %v2063_v17 = vpack.c.bf16 %v1288_v38, %v1287_v34  ;;  %v1447_v34 = vld [vmem:[%s2711_s5 + $0x18] sm:$0xff]  ;;  %v1761_v38 = vld [vmem:[%s2711_s5 + $0x20] sm:$0xff] }
 0x620   :  { %1919 = vmatmul.mubr.msk.f32.vlgmr.msra.gmra.mrb[10].mxu0 %vm323_vm5, %v945_v44 }
 0x621   :  { %2046 = vmatpush3.bf16.msra.mxu0 %v2043_v49 }
 0x622   :  { %2048 = vmatprep.subr.bf16.mxu0 %v2047_v52 }
 0x625   :  { %2050 = vmatpush3.bf16.msra.mxu0 %v2047_v52  ;;  %v1185_v52 = vrot.slane %v2476_v11, %v1184_v50 }
 0x626   :  { %2060 = vmatprep.subr.bf16.mxu0 %v2059_v37 }
 0x6ef   :  { %v1906_v53 = vpop.f32.mrb[8].mxu0 }
 0x6f0   :  { %1045 = vrot.lane.b32.xlu1 %v1906_v53, %s2341_s17  ;;  %v824_v54 = vpop.f32.mrb[9].mxu0 }
 0x6f1   :  { %1043 = vrot.lane.b32.xlu0 %v824_v54, %s2341_s17 }
 0x6f3   :  { %v1920_v55 = vpop.f32.mrb[10].mxu0 }
 0x6f4   :  { %1053 = vrot.lane.b32.xlu1 %v1920_v55, %s2342_s18  ;;  %v1024_v56 = vpop.f32.mrb[11].mxu0  ;;  %v1191_v55 = vrot.slane %v2476_v11, %v1190_v51 }
 0x6f5   :  { %1051 = vrot.lane.b32.xlu0 %v1024_v56, %s2342_s18 }
 0x762   :  { %v1046_v58 = vpop.permute.xlu1 %1045 }
 0x763   :  { %v1044_v59 = vpop.permute.xlu0 %1043  ;;  %v1060_v1 = vsel %vm323_vm5, %v1058_v62, %v1046_v58  ;;  %v1292_v62 = vld [vmem:[%s2710_s4 + $0x38] sm:$0xff] }
 0x764   :  { %v1059_v63 = vsel %vm323_vm5, %v1057_v60, %v1044_v59 }
 0x766   :  { %v1054_v61 = vpop.permute.xlu1 %1053 }
 0x767   :  { %v1052_v0 = vpop.permute.xlu0 %1051  ;;  %v1063_v3 = vsel %vm1061_vm6, %v1060_v1, %v1054_v61  ;;  %v1291_v61 = vld [vmem:[%s2710_s4 + $0x30] sm:$0xff] }
 0x768   :  { %v1062_v2 = vsel %vm1061_vm6, %v1059_v63, %v1052_v0  ;;  %v2071_v63 = vpack.c.bf16 %v1292_v62, %v1291_v61  ;;  %v1200_v0 = vsub.s32 4, %v2473_v9 }
 0x769   :  { %1929 = vmatprep.mubr.msk.f32.mxu0 %vm151_vm0, %v1062_v2 }
 0x76a   :  { %1930 = vmatmul.mubr.msk.f32.vlgmr.msra.gmra.mrb[12].mxu0 %vm151_vm0, %v1063_v3  ;;  %v1201_v1 = vrot.slane %v2476_v11, %v1200_v0 }
 0x76b   :  { %2062 = vmatpush3.bf16.msra.mxu0 %v2059_v37  ;;  %v2079_v37 = vpack.c.bf16 %v1447_v34, %v1446_v32 }
 0x76c   :  { %2064 = vmatprep.subr.bf16.mxu0 %v2063_v17 }
 0x76f   :  { %2066 = vmatpush3.bf16.msra.mxu0 %v2063_v17  ;;  %v1762_v17 = vld [vmem:[%s2711_s5 + $0x28] sm:$0xff] }
 0x770   :  { %2068 = vmatprep.subr.bf16.mxu0 %v2067_v41  ;;  %v2083_v39 = vpack.c.bf16 %v1762_v17, %v1761_v38 }
 0x773   :  { %2070 = vmatpush3.bf16.msra.mxu0 %v2067_v41 }
 0x774   :  { %2072 = vmatprep.subr.bf16.mxu0 %v2071_v63 }
 0x777   :  { %2074 = vmatpush3.bf16.msra.mxu0 %v2071_v63  ;;  %v1764_v63 = vld [vmem:[%s2711_s5 + $0x38] sm:$0xff] }
 0x83d   :  { %v1931_v48 = vpop.f32.mrb[12].mxu0 }
 0x83e   :  { %v1150_v6 = vadd.f32 %v1931_v48, %v1071_v36  ;;  %v1144_v8 = vpop.f32.mrb[13].mxu0 }
 0x83f   :  { %v1145_v10 = vadd.f32 %v1144_v8, %v1071_v36  ;;  %v1295_v8 = vsub.s32 5, %v2473_v9 }
 0x840   :  { %v1154_v47 = vadd.f32 %v1150_v6, %v2469_v7 }
 0x841   :  { %v1153_v35 = vadd.f32 %v1145_v10, %v2462_v5  ;;  %v1194_v5 = vld [vmem:[#allocation7] sm:$0xff]  ;;  %v1296_v10 = vrot.slane %v2476_v11, %v1295_v8 }
 0x842   :  { %v1158_v12 = vsel %vm151_vm0, %v1154_v47, 0.0  ;;  %v2051_v27 = vpack.c.bf16 %v1195_v26, %v1194_v5 }
 0x843   :  { %1159 = vadd.xlane.f32.xlu1 %v1158_v12  ;;  %v1155_v13 = vsel %vm151_vm0, %v1153_v35, 0.0 }
 0x844   :  { %1156 = vadd.xlane.f32.xlu0 %v1155_v13  ;;  %2052 = vmatprep.subr.bf16.mxu1 %v2051_v27 }
 0x845   :  { %2054 = vmatpush3.bf16.msra.mxu1 %v2051_v27 }
 0x846   :  { %2056 = vmatprep.subr.bf16.mxu1 %v2055_v29 }
 0x849   :  { %2058 = vmatpush3.bf16.msra.mxu1 %v2055_v29  ;;  %v1445_v29 = vld [vmem:[%s2711_s5 + $0x8] sm:$0xff] }
 0x84a   :  { %v2075_v30 = vpack.c.bf16 %v1445_v29, %v1444_v28 }
 0x84c   :  { %2076 = vmatprep.subr.bf16.mxu1 %v2075_v30 }
 0x8d0   :  { %v1160_v15 = vpop.xlane.xlu1 %1159 }
 0x8d1   :  { %v1163_v18 = vmul.f32 0.03125, %v1160_v15  ;;  %v1157_v19 = vpop.xlane.xlu0 %1156 }
 0x8d2   :  { %v1162_v20 = vmul.f32 0.03125, %v1157_v19 }
 0x8d3   :  { %v1165_v22 = vsub.f32 %v1154_v47, %v1163_v18 }
 0x8d4   :  { %v1164_v23 = vsub.f32 %v1153_v35, %v1162_v20 }
 0x8d5   :  { %v1167_v25 = vmul.f32 %v1165_v22, %v1165_v22 }
 0x8d6   :  { %v1166_v24 = vmul.f32 %v1164_v23, %v1164_v23 }
 0x8d7   :  { %v1171_v7 = vsel %vm151_vm0, %v1167_v25, 0.0 }
 0x8d8   :  { %v1168_v16 = vsel %vm151_vm0, %v1166_v24, 0.0 }
 0x8d9   :  { %1169 = vadd.xlane.f32.xlu0 %v1168_v16 }
 0x8dd   :  { %1172 = vadd.xlane.f32.xlu0 %v1171_v7 }
 0x966   :  { %v1170_v42 = vpop.xlane.xlu0 %1169 }
 0x967   :  { %v1174_v43 = vmul.f32 0.03125, %v1170_v42 }
 0x969   :  { %v1176_v44 = vadd.f32 1e-05, %v1174_v43 }
 0x96a   :  { %v1173_v45 = vpop.xlane.xlu0 %1172 }
 0x96b   :  { %2197 = vrsqrt.f32 %v1176_v44  ;;  %v1175_v46 = vmul.f32 0.03125, %v1173_v45 }
 0x96d   :  { %v1177_v49 = vadd.f32 1e-05, %v1175_v46  ;;  %v1409_v46 = vsub.s32 6, %v2473_v9 }
 0x96f   :  { %2199 = vrsqrt.f32 %v1177_v49  ;;  %v1415_v49 = vsub.s32 7, %v2473_v9  ;;  %v1410_v50 = vrot.slane %v2476_v11, %v1409_v46 }
 0x975   :  { %v2198_v53 = vpop.eup %2197 }
 0x976   :  { %v1180_v54 = vmul.f32 %v2198_v53, %v1164_v23  ;;  %v1416_v53 = vrot.slane %v2476_v11, %v1415_v49  ;;  %v1763_v11 = vld [vmem:[%s2711_s5 + $0x30] sm:$0xff] }
 0x978   :  { %v1186_v56 = vmul.f32 %v1185_v52, %v1180_v54 }
 0x979   :  { %v2200_v21 = vpop.eup %2199 }
 0x97a   :  { %v1181_v57 = vmul.f32 %v2200_v21, %v1165_v22  ;;  %v1192_v58 = vadd.f32 %v1191_v55, %v1186_v56 }
 0x97c   :  { %v1187_v59 = vmul.f32 %v1185_v52, %v1181_v57  ;;  %1940 = vmatprep.mubr.msk.f32.mxu1 %vm151_vm0, %v1192_v58 }
 0x97e   :  { %v1193_v60 = vadd.f32 %v1191_v55, %v1187_v59 }
 0x980   :  { %1941 = vmatmul.mubr.msk.f32.vlgmr.msra.gmra.mrb[6].mxu1 %vm151_vm0, %v1193_v60 }
 0x981   :  { %2078 = vmatpush3.bf16.msra.mxu1 %v2075_v30 }
 0x982   :  { %2080 = vmatprep.subr.bf16.mxu1 %v2079_v37 }
 0x985   :  { %2082 = vmatpush3.bf16.msra.mxu1 %v2079_v37 }
 0x986   :  { %2084 = vmatprep.subr.bf16.mxu1 %v2083_v39 }
 0xa53   :  { %v1942_v2 = vpop.f32.mrb[6].mxu1 }
 0xa54   :  { %v1280_v3 = vadd.f32 %v1942_v2, %v1201_v1  ;;  %v1274_v4 = vpop.f32.mrb[7].mxu1 }
 0xa55   :  { %v1275_v36 = vadd.f32 %v1274_v4, %v1201_v1  ;;  %v2087_v4 = vpack.c.bf16 %v1764_v63, %v1763_v11 }
 0xa56   :  { %v1284_v6 = vmax.f32 %v1280_v3, 0.0 }
 0xa57   :  { %v1283_v48 = vmax.f32 %v1275_v36, 0.0  ;;  %v1769_v36 = vld [vmem:[%s2711_s5 + $0x40] sm:$0xff] }
 0xa59   :  { %1959 = vmatprep.mubr.msk.f32.mxu0 %vm1297_vm7, %v1283_v48  ;;  %v1770_v48 = vld [vmem:[%s2711_s5 + $0x48] sm:$0xff] }
 0xa5a   :  { %1960 = vmatmul.mubr.msk.f32.vlgmr.msra.gmra.mrb[14].mxu0 %vm1297_vm7, %v1284_v6 }
 0xb2d   :  { %v1961_v47 = vpop.f32.mrb[14].mxu0 }
 0xb2e   :  { %v1376_v35 = vadd.f32 %v1961_v47, %v1296_v10  ;;  %v1370_v12 = vpop.f32.mrb[15].mxu0  ;;  %v1771_v47 = vld [vmem:[%s2711_s5 + $0x50] sm:$0xff] }
 0xb2f   :  { %v1371_v13 = vadd.f32 %v1370_v12, %v1296_v10  ;;  %v2091_v10 = vpack.c.bf16 %v1770_v48, %v1769_v36 }
 0xb30   :  { %v1380_v15 = vadd.f32 %v1376_v35, %v1193_v60  ;;  %v2343_v60 = vmov 0.0   ;;  %v1772_v35 = vld [vmem:[%s2711_s5 + $0x58] sm:$0xff]  ;;  %s2344_s5 = smov [#allocation10]  }
 0xb31   :  { %v1379_v18 = vadd.f32 %v1371_v13, %v1192_v58  ;;  %v1725_v9 = vsel %vm131_vm8, 1.0, %v2343_v60  ;;  %v1726_v62 = vsel %vm132_vm9, 1.0, %v2343_v60  ;;  %v1727_v12 = vsel %vm137_vm11, 1.0, %v2343_v60  ;;  %s1711_s0 = sshll.u32 %s2344_s5, 4  ;;  %s1712_s0 = int_to_ptr.vmem [resolvable:$true] %s1711_s0 }
 0xb32   :  { %v1384_v19 = vsel %vm151_vm0, %v1380_v15, 0.0  ;;  %s2293_s30 = scalar_lea.vmem %s1712_s0, 256  ;;  %p2298_p5 = scmp.lt.s32.totalorder %s1712_s0, %s1712_s0 }
 0xb33   :  { %1385 = vadd.xlane.f32.xlu0 %v1384_v19  ;;  %v1381_v20 = vsel %vm151_vm0, %v1379_v18, 0.0  ;;  %v1728_v19 = vsel %vm138_vm13, 1.0, %v2343_v60  ;;  %p2294_p4 = scmp.ne.s32.totalorder %s1712_s0, %s2293_s30  ;;  %p2299_p6 = scmp.lt.s32.totalorder %s2293_s30, %s2293_s30 }
 0xb34   :  { %1382 = vadd.xlane.f32.xlu1 %v1381_v20 }
 0xb35   :  { %p2300_p7 = por %p2299_p6, %p2298_p5 }
 0xb37   :  { %p2301_p8 = pnand %p2300_p7, %p2294_p4 }
 0xbc0   :  { %v1386_v22 = vpop.xlane.xlu0 %1385 }
 0xbc1   :  { %v1388_v23 = vmul.f32 0.03125, %v1386_v22  ;;  %v1383_v24 = vpop.xlane.xlu1 %1382  ;;  %v1775_v22 = vld [vmem:[#allocation8 + $0x8] ss:$0 sm:$0xff] }
 0xbc2   :  { %v1387_v16 = vmul.f32 0.03125, %v1383_v24 }
 0xbc3   :  { %v1390_v25 = vsub.f32 %v1380_v15, %v1388_v23  ;;  %v2095_v15 = vpack.c.bf16 %v1772_v35, %v1771_v47 }
 0xbc4   :  { %v1389_v7 = vsub.f32 %v1379_v18, %v1387_v16 }
 0xbc5   :  { %v1392_v5 = vmul.f32 %v1390_v25, %v1390_v25 }
 0xbc6   :  { %v1391_v26 = vmul.f32 %v1389_v7, %v1389_v7 }
 0xbc7   :  { %v1396_v27 = vsel %vm151_vm0, %v1392_v5, 0.0 }
 0xbc8   :  { %1397 = vadd.xlane.f32.xlu0 %v1396_v27  ;;  %v1393_v14 = vsel %vm151_vm0, %v1391_v26, 0.0 }
 0xbc9   :  { %1394 = vadd.xlane.f32.xlu1 %v1393_v14 }
 0xc55   :  { %v1398_v40 = vpop.xlane.xlu0 %1397 }
 0xc56   :  { %v1400_v41 = vmul.f32 0.03125, %v1398_v40  ;;  %v1395_v42 = vpop.xlane.xlu1 %1394 }
 0xc57   :  { %v1399_v43 = vmul.f32 0.03125, %v1395_v42 }
 0xc58   :  { %v1402_v44 = vadd.f32 1e-05, %v1400_v41 }
 0xc59   :  { %v1401_v45 = vadd.f32 1e-05, %v1399_v43 }
 0xc5a   :  { %2201 = vrsqrt.f32 %v1402_v44 }
 0xc5b   :  { %2203 = vrsqrt.f32 %v1401_v45 }
 0xc64   :  { %v2202_v51 = vpop.eup %2201 }
 0xc65   :  { %v2204_v52 = vpop.eup %2203  ;;  %v1406_v54 = vmul.f32 %v2202_v51, %v1390_v25 }
 0xc66   :  { %v1405_v55 = vmul.f32 %v2204_v52, %v1389_v7 }
 0xc67   :  { %v1412_v56 = vmul.f32 %v1410_v50, %v1406_v54 }
 0xc68   :  { %v1411_v21 = vmul.f32 %v1410_v50, %v1405_v55 }
 0xc69   :  { %v1418_v57 = vadd.f32 %v1416_v53, %v1412_v56 }
 0xc6a   :  { %v1417_v58 = vadd.f32 %v1416_v53, %v1411_v21 }
 0xc6b   :  { %v1423_v59 = vrot.slane %v1418_v57, 7  ;;  %v1432_v8 = vrot.slane %v1418_v57, 1 }
 0xc6c   :  { %v1422_v61 = vrot.slane %v1417_v58, 7  ;;  %v1431_v6 = vrot.slane %v1417_v58, 1 }
 0xc6d   :  { %v1436_v33 = vsel %vm1430_vm12, %v1432_v8, 0.0 }
 0xc6e   :  { %v1424_v0 = vsel %vm1421_vm10, %v1422_v61, %v1423_v59  ;;  %v1427_v1 = vsel %vm1421_vm10, 0.0, %v1422_v61  ;;  %v1433_v13 = vsel %vm1430_vm12, %v1431_v6, %v1432_v8  ;;  %v1438_v20 = vmul.f32 %v1728_v19, %v1436_v33 }
 0xc6f   :  { %v1428_v2 = vmul.f32 %v1725_v9, %v1427_v1  ;;  %v1429_v3 = vmul.f32 %v1726_v62, %v1424_v0  ;;  %v1437_v18 = vmul.f32 %v1727_v12, %v1433_v13 }
 0xc71   :  { %1970 = vmatprep.mubr.msk.f32.mxu1 %vm151_vm0, %v1428_v2 }
 0xc72   :  { %1971 = vmatmul.mubr.msk.f32.vlgmr.msra.gmra.mrb[8].mxu1 %vm151_vm0, %v1429_v3 }
 0xc73   :  { %2086 = vmatpush3.bf16.msra.mxu1 %v2083_v39  ;;  %1981 = vmatprep.mubr.msk.f32.mxu1 %vm151_vm0, %v1417_v58 }
 0xc74   :  { %2088 = vmatprep.subr.bf16.mxu1 %v2087_v4 }
 0xc77   :  { %2090 = vmatpush3.bf16.msra.mxu1 %v2087_v4 }
 0xc78   :  { %2092 = vmatprep.subr.bf16.mxu1 %v2091_v10 }
 0xc7a   :  { %1982 = vmatmul.mubr.msk.f32.vlgmr.msra.gmra.mrb[8].mxu1 %vm151_vm0, %v1418_v57 }
 0xc7b   :  { %2094 = vmatpush3.bf16.msra.mxu1 %v2091_v10  ;;  %1992 = vmatprep.mubr.msk.f32.mxu1 %vm151_vm0, %v1437_v18 }
 0xc7c   :  { %2096 = vmatprep.subr.bf16.mxu1 %v2095_v15 }
 0xc7f   :  { %2098 = vmatpush3.bf16.msra.mxu1 %v2095_v15 }
 0xc82   :  { %1993 = vmatmul.mubr.msk.f32.vlgmr.msra.gmra.mrb[8].mxu1 %vm151_vm0, %v1438_v20 }
 0xd55   :  { %v1994_v23 = vpop.f32.mrb[8].mxu1 }
 0xd56   :  { %v1701_v24 = vadd.f32 %v1994_v23, %v1775_v22  ;;  %v1685_v16 = vpop.f32.mrb[9].mxu1 }
 0xd57   :  { %v1700_v25 = vadd.f32 %v1775_v22, %v1685_v16 }
 0xd58   :  { %v1703_v7 = vmax.f32 %v1701_v24, 0.0 }
 0xd59   :  { %v1702_v31 = vmax.f32 %v1700_v25, 0.0 }
 0xd5a   :  { %1705 = vst.msk [vmem:[#allocation10 + $0x8] sm:$0xff] %vm151_vm0, %v1703_v7 }
 0xd5b   :  { %1704 = vst.msk [vmem:[#allocation10] sm:$0xff] %vm151_vm0, %v1702_v31 }
 0xd5c   :  { %2304 = shalt.err (!%p2301_p8)
}
 0xd5d   :  { %s2305_s9 = scalar_lea.hbm %s2713_s7, 256 }
 0xd5e   :  { %p2306_p9 = scmp.ne.s32.totalorder %s2713_s7, %s2305_s9  ;;  %p2309_p10 = scmp.lt.u32.totalorder %s2305_s9, %s2713_s7 }
 0xd60   :  { %p2311_p11 = pnand %p2309_p10, %p2306_p9 }
 0xd62   :  { %2314 = shalt.err (!%p2311_p11)
}
 0xd63   :  { %1717 = dma.vmem_to_hbm [thread:$0]  %s1712_s0, 256, %s2713_s7, [#allocation4], %s2325_s13, %s2325_s13, %s2326_s14  }
 0xd64   :  { %2321 = dma.done.wait [#allocation4], 256  }
 0xd65   :  { %2322 = vsyncadd [#allocation4], 4294967040 }
 0xd66   :  { %1721 = vsyncpa [#allocation3], 1 }
 0xd67   :  { %1722 = vsyncpa [#allocation6], 1 }
 0xd68   :  { %1723 = vsyncpa [#allocation9], 1 }
 0xd69   :  { %1724 = vsyncpa [#allocation4], 1 }

</bundles_post_ra>
